<compile_context>
chip_gen: v7x
topology: tpu7x:2x2x1
jax: 0.10.0
libtpu: 0.0.40
codegen_flags: <defaults>
</compile_context>

<pallas_src>
import jax
import jax.numpy as jnp
from jax.experimental import pallas as pl
from jax.experimental.pallas import tpu as pltpu

TEXT_DIM = 768
AUDIO_DIM = 768


def _mmser_kernel(text_ref, audio_ref, wt_ref, wa_ref, b_ref,
                  logits_ref, softmax_ref):
    # logits = [text | audio] @ W_eff + b_eff, computed as two accumulated
    # matmuls so no (TB, 1536) concat is materialized in VMEM.
    logits = (
        jnp.dot(text_ref[...], wt_ref[...], preferred_element_type=jnp.float32)
        + jnp.dot(audio_ref[...], wa_ref[...], preferred_element_type=jnp.float32)
        + b_ref[...]
    )
    logits_ref[...] = logits

    # Numerically stable softmax over dim=1 (the class axis).
    m = jnp.max(logits, axis=1, keepdims=True)
    e = jnp.exp(logits - m)
    softmax_ref[...] = e * pl.reciprocal(jnp.sum(e, axis=1, keepdims=True),
                                         approx=False)


def fold_params(params):
    """One-time algebraic fold of the activation-free linear chain.

    Returns (w_text, w_audio, b_eff):
      w_text  : (768, C) — rows of W_eff acting on text_embed
      w_audio : (768, C) — rows of W_eff acting on audio_embed
      b_eff   : (1, C)
    """
    w_eff = params["w0"] @ params["w1"] @ params["w2"] @ params["w3"]
    b_eff = ((params["b0"] @ params["w1"] + params["b1"]) @ params["w2"]
             + params["b2"]) @ params["w3"] + params["b3"]
    return (w_eff[:TEXT_DIM], w_eff[TEXT_DIM:], b_eff)


def flexible_mmser_forward(text_embed, audio_embed, folded, *, block_b=1024):
    """folded = fold_params(params).  block_b: batch tile (rows per grid step).

    block_b=1024 keeps double-buffered f32 embedding tiles (~12 MiB) well under
    the 32 MiB scoped VMEM default on v5e/v6e and v7x's 64 MiB physical VMEM.
    """
    w_text, w_audio, b_eff = folded
    B = text_embed.shape[0]
    C = w_text.shape[1]

    # Batch tiling: single full-array block for small B; otherwise pad B up to
    # a multiple of block_b so every grid step sees a full (tb, 768) tile.
    if B <= block_b:
        tb, padded_b = B, B
    else:
        tb = block_b
        padded_b = ((B + tb - 1) // tb) * tb
        if padded_b != B:
            pad = padded_b - B
            text_embed = jnp.pad(text_embed, ((0, pad), (0, 0)))
            audio_embed = jnp.pad(audio_embed, ((0, pad), (0, 0)))
    grid = (padded_b // tb,)

    batch_spec = lambda d: pl.BlockSpec((tb, d), lambda i: (i, 0))
    resident = lambda shape: pl.BlockSpec(shape, lambda i: (0, 0))

    logits, softmax = pl.pallas_call(
        _mmser_kernel,
        out_shape=(
            jax.ShapeDtypeStruct((padded_b, C), jnp.float32),
            jax.ShapeDtypeStruct((padded_b, C), jnp.float32),
        ),
        grid=grid,
        in_specs=[
            batch_spec(TEXT_DIM),          # text tile, pipelined over batch
            batch_spec(AUDIO_DIM),         # audio tile, pipelined over batch
            resident(w_text.shape),        # folded weights stay VMEM-resident
            resident(w_audio.shape),
            resident(b_eff.shape),
        ],
        out_specs=(
            pl.BlockSpec((tb, C), lambda i: (i, 0)),
            pl.BlockSpec((tb, C), lambda i: (i, 0)),
        ),
        compiler_params=pltpu.CompilerParams(
            dimension_semantics=("parallel",),   # megacore sharding on v7x
        ),
    )(text_embed, audio_embed, w_text, w_audio, b_eff)

    if padded_b != B:
        logits = logits[:B]
        softmax = softmax[:B]
    return logits, softmax


def init_params(key, num_classes=4):
    """Deterministic synthetic init matching nn.Linear shapes (stored transposed)."""
    dims = [(TEXT_DIM + AUDIO_DIM, 512), (512, 256), (256, 64), (64, num_classes)]
    params = {}
    for idx, (fan_in, fan_out) in enumerate(dims):
        key, kw, kb = jax.random.split(key, 3)
        bound = 1.0 / jnp.sqrt(fan_in)
        params[f"w{idx}"] = jax.random.uniform(
            kw, (fan_in, fan_out), jnp.float32, -bound, bound)
        params[f"b{idx}"] = jax.random.uniform(
            kb, (1, fan_out), jnp.float32, -bound, bound)
    return params


def reference_forward(text_embed, audio_embed, params):
    """Layer-by-layer reference (matches the PyTorch module exactly)."""
    x = jnp.concatenate([text_embed, audio_embed], axis=1)
    x = x @ params["w0"] + params["b0"]
    x = x @ params["w1"] + params["b1"]
    x = x @ params["w2"] + params["b2"]
    logits = x @ params["w3"] + params["b3"]
    return logits, jax.nn.softmax(logits, axis=1)


if __name__ == "__main__":
    key = jax.random.PRNGKey(0)
    kp, kt, ka = jax.random.split(key, 3)

    params = init_params(kp, num_classes=4)
    folded = fold_params(params)

    # Case 1: tiny batch — single full-array block.
    B = 2
    text = jax.random.normal(kt, (B, TEXT_DIM), jnp.float32)
    audio = jax.random.normal(ka, (B, AUDIO_DIM), jnp.float32)
    logits, softmax = flexible_mmser_forward(text, audio, folded)
    jax.block_until_ready((logits, softmax))

    ref_logits, ref_softmax = reference_forward(text, audio, params)
    assert logits.shape == (B, 4) and softmax.shape == (B, 4)
    # Tolerances relaxed slightly: the layer fold reassociates f32 math.
    assert jnp.allclose(logits, ref_logits, atol=1e-3, rtol=1e-3)
    assert jnp.allclose(softmax, ref_softmax, atol=1e-4, rtol=1e-3)
    assert jnp.allclose(jnp.sum(softmax, axis=1), 1.0, atol=1e-5)

    # Case 2: exercise the batch-tiled + padded multi-step grid path.
    B2 = 20
    kt2, ka2 = jax.random.split(jax.random.PRNGKey(1))
    text2 = jax.random.normal(kt2, (B2, TEXT_DIM), jnp.float32)
    audio2 = jax.random.normal(ka2, (B2, AUDIO_DIM), jnp.float32)
    logits2, softmax2 = flexible_mmser_forward(text2, audio2, folded, block_b=8)
    jax.block_until_ready((logits2, softmax2))
    ref_logits2, ref_softmax2 = reference_forward(text2, audio2, params)
    assert logits2.shape == (B2, 4) and softmax2.shape == (B2, 4)
    assert jnp.allclose(logits2, ref_logits2, atol=1e-3, rtol=1e-3)
    assert jnp.allclose(softmax2, ref_softmax2, atol=1e-4, rtol=1e-3)

    print("KERNEL_OK")
</pallas_src>

<mosaic_0001>
module attributes {stable_mosaic.version = 11 : i64} {
  func.func @_mmser_kernel(%arg0: i32, %arg1: memref<2x768xf32, #tpu.memory_space<vmem>>, %arg2: memref<2x768xf32, #tpu.memory_space<vmem>>, %arg3: memref<768x4xf32, #tpu.memory_space<vmem>>, %arg4: memref<768x4xf32, #tpu.memory_space<vmem>>, %arg5: memref<1x4xf32, #tpu.memory_space<vmem>>, %arg6: memref<2x4xf32, #tpu.memory_space<vmem>>, %arg7: memref<2x4xf32, #tpu.memory_space<vmem>>) attributes {dimension_semantics = [#tpu.dimension_semantics<parallel>], iteration_bounds = array<i64: 1>, scalar_prefetch = 0 : i64, scratch_operands = 0 : i64, tpu.core_type = #tpu.core_type<tc>, window_params = [{transform_indices = @transform_0, window_bounds = array<i64: 2, 768>}, {transform_indices = @transform_1, window_bounds = array<i64: 2, 768>}, {pipeline_mode = #tpu.pipeline_mode<synchronous>, transform_indices = @transform_2, window_bounds = array<i64: 768, 4>}, {pipeline_mode = #tpu.pipeline_mode<synchronous>, transform_indices = @transform_3, window_bounds = array<i64: 768, 4>}, {pipeline_mode = #tpu.pipeline_mode<synchronous>, transform_indices = @transform_4, window_bounds = array<i64: 1, 4>}, {transform_indices = @transform_5, window_bounds = array<i64: 2, 4>}, {transform_indices = @transform_6, window_bounds = array<i64: 2, 4>}]} {
    %c0 = arith.constant 0 : index
    %c0_0 = arith.constant 0 : index
    %0 = vector.load %arg1[%c0, %c0_0] : memref<2x768xf32, #tpu.memory_space<vmem>>, vector<2x768xf32>
    %c0_1 = arith.constant 0 : index
    %c0_2 = arith.constant 0 : index
    %1 = vector.load %arg3[%c0_1, %c0_2] : memref<768x4xf32, #tpu.memory_space<vmem>>, vector<768x4xf32>
    %cst = arith.constant dense<0.000000e+00> : vector<2x4xf32>
    %2 = tpu.matmul %0, %1, %cst {dimension_numbers = #tpu.dot_dimension_numbers<[1], [0], [0], [1], [0, 0, 1, 1], [], []>} : vector<2x768xf32>, vector<768x4xf32>, vector<2x4xf32> -> vector<2x4xf32>
    %c0_3 = arith.constant 0 : index
    %c0_4 = arith.constant 0 : index
    %3 = vector.load %arg2[%c0_3, %c0_4] : memref<2x768xf32, #tpu.memory_space<vmem>>, vector<2x768xf32>
    %c0_5 = arith.constant 0 : index
    %c0_6 = arith.constant 0 : index
    %4 = vector.load %arg4[%c0_5, %c0_6] : memref<768x4xf32, #tpu.memory_space<vmem>>, vector<768x4xf32>
    %cst_7 = arith.constant dense<0.000000e+00> : vector<2x4xf32>
    %5 = tpu.matmul %3, %4, %cst_7 {dimension_numbers = #tpu.dot_dimension_numbers<[1], [0], [0], [1], [0, 0, 1, 1], [], []>} : vector<2x768xf32>, vector<768x4xf32>, vector<2x4xf32> -> vector<2x4xf32>
    %6 = arith.addf %2, %5 : vector<2x4xf32>
    %c0_8 = arith.constant 0 : index
    %c0_9 = arith.constant 0 : index
    %7 = vector.load %arg5[%c0_8, %c0_9] : memref<1x4xf32, #tpu.memory_space<vmem>>, vector<1x4xf32>
    %8 = vector.broadcast %7 : vector<1x4xf32> to vector<2x4xf32>
    %9 = arith.addf %6, %8 : vector<2x4xf32>
    %c0_10 = arith.constant 0 : index
    %c0_11 = arith.constant 0 : index
    %10 = vector.load %arg6[%c0_10, %c0_11] : memref<2x4xf32, #tpu.memory_space<vmem>>, vector<2x4xf32>
    tpu.vector_store %arg6[%c0_10, %c0_11], %9 {strides = array<i32>} : memref<2x4xf32, #tpu.memory_space<vmem>>, vector<2x4xf32>,
    %cst_12 = arith.constant dense<0xFF800000> : vector<2xf32>
    %11 = vector.multi_reduction <maximumf>, %9, %cst_12 [1] : vector<2x4xf32> to vector<2xf32>
    %12 = vector.shape_cast %11 : vector<2xf32> to vector<2x1xf32>
    %13 = vector.broadcast %12 : vector<2x1xf32> to vector<2x4xf32>
    %14 = arith.subf %9, %13 : vector<2x4xf32>
    %15 = math.exp %14 : vector<2x4xf32>
    %cst_13 = arith.constant dense<0.000000e+00> : vector<2xf32>
    %16 = vector.multi_reduction <add>, %15, %cst_13 [1] : vector<2x4xf32> to vector<2xf32>
    %17 = vector.shape_cast %16 : vector<2xf32> to vector<2x1xf32>
    %18 = tpu.reciprocal %17 : vector<2x1xf32> -> vector<2x1xf32>
    %19 = vector.broadcast %18 : vector<2x1xf32> to vector<2x4xf32>
    %20 = arith.mulf %15, %19 : vector<2x4xf32>
    %c0_14 = arith.constant 0 : index
    %c0_15 = arith.constant 0 : index
    %21 = vector.load %arg7[%c0_14, %c0_15] : memref<2x4xf32, #tpu.memory_space<vmem>>, vector<2x4xf32>
    tpu.vector_store %arg7[%c0_14, %c0_15], %20 {strides = array<i32>} : memref<2x4xf32, #tpu.memory_space<vmem>>, vector<2x4xf32>,
    return
  }
  func.func @transform_0(%arg0: i32) -> (i32, i32) {
    %c0_i32 = arith.constant 0 : i32
    %c0_i32_0 = arith.constant 0 : i32
    return %arg0, %c0_i32 : i32, i32
  }
  func.func @transform_1(%arg0: i32) -> (i32, i32) {
    %c0_i32 = arith.constant 0 : i32
    %c0_i32_0 = arith.constant 0 : i32
    return %arg0, %c0_i32 : i32, i32
  }
  func.func @transform_2(%arg0: i32) -> (i32, i32) {
    %c0_i32 = arith.constant 0 : i32
    %c0_i32_0 = arith.constant 0 : i32
    %c0_i32_1 = arith.constant 0 : i32
    return %c0_i32, %c0_i32_0 : i32, i32
  }
  func.func @transform_3(%arg0: i32) -> (i32, i32) {
    %c0_i32 = arith.constant 0 : i32
    %c0_i32_0 = arith.constant 0 : i32
    %c0_i32_1 = arith.constant 0 : i32
    return %c0_i32, %c0_i32_0 : i32, i32
  }
  func.func @transform_4(%arg0: i32) -> (i32, i32) {
    %c0_i32 = arith.constant 0 : i32
    %c0_i32_0 = arith.constant 0 : i32
    %c0_i32_1 = arith.constant 0 : i32
    return %c0_i32, %c0_i32_0 : i32, i32
  }
  func.func @transform_5(%arg0: i32) -> (i32, i32) {
    %c0_i32 = arith.constant 0 : i32
    %c0_i32_0 = arith.constant 0 : i32
    return %arg0, %c0_i32 : i32, i32
  }
  func.func @transform_6(%arg0: i32) -> (i32, i32) {
    %c0_i32 = arith.constant 0 : i32
    %c0_i32_0 = arith.constant 0 : i32
    return %arg0, %c0_i32 : i32, i32
  }
}

</mosaic_0001>

<bundles_post_ra>
// kernel: tpu_custom_call.1
= control target key start
LH: loop header
LB: loop body
LE: loop exit
PB: predicated region body
PF: predicated region fallthrough
CT: control target
= control target key end

     0   :  { %12 = vsyncpa [#allocation3], 0  ;;  %v1218_v47 = vmov 1983009808   ;;  %v226_v49 = vlaneseq  ;;  %s1906_s0 = inlined_call_operand.vmem [shape: f32[2,768], index: 0, kind: input, shape index: {}]   ;;  %s1907_s1 = inlined_call_operand.vmem [shape: f32[2,768], index: 1, kind: input, shape index: {}]   ;;  %s1908_s2 = inlined_call_operand.vmem [shape: f32[768,4], index: 2, kind: input, shape index: {}]   ;;  %s1909_s3 = inlined_call_operand.vmem [shape: f32[768,4], index: 3, kind: input, shape index: {}]   ;;  %s1910_s4 = inlined_call_operand.vmem [shape: f32[1,4], index: 4, kind: input, shape index: {}]   ;;  %s1911_s5 = inlined_call_operand.hbm [shape: f32[2,4], index: 5, kind: output, shape index: {0}]   ;;  %s1912_s6 = inlined_call_operand.hbm [shape: f32[2,4], index: 6, kind: output, shape index: {1}]  }
   0x1   :  { %v140_v0 = vld [vmem:[%s1909_s3 + $0x80] sm:$0xff]  ;;  %v141_v1 = vld [vmem:[%s1909_s3 + $0x88] sm:$0xff]  ;;  %v142_v11 = vld [vmem:[%s1909_s3 + $0x90] sm:$0xff]  ;;  %v224_v48 = vunpack.c.l.s4 %v1218_v47 }
   0x2   :  { %v172_v2 = vld [vmem:[%s1909_s3 + $0x180] sm:$0xff]  ;;  %v969_v3 = vpack.c.bf16 %v141_v1, %v140_v0  ;;  %v173_v4 = vld [vmem:[%s1909_s3 + $0x188] sm:$0xff]  ;;  %v143_v13 = vld [vmem:[%s1909_s3 + $0x98] sm:$0xff]  ;;  %v227_v0 = vshrl.u32 %v226_v49, 7 }
   0x3   :  { %v124_v5 = vld [vmem:[%s1909_s3] sm:$0xff]  ;;  %v125_v6 = vld [vmem:[%s1909_s3 + $0x8] sm:$0xff]  ;;  %v1001_v7 = vpack.c.bf16 %v173_v4, %v172_v2  ;;  %v174_v14 = vld [vmem:[%s1909_s3 + $0x190] sm:$0xff]  ;;  %v973_v16 = vpack.c.bf16 %v143_v13, %v142_v11  ;;  %v225_v63 = vunpack.c.0.s8 %v224_v48 }
   0x4   :  { %v971_v8 = vpack.c.bf16 %v125_v6, %v124_v5  ;;  %v156_v9 = vld [vmem:[%s1909_s3 + $0x100] sm:$0xff]  ;;  %v157_v10 = vld [vmem:[%s1909_s3 + $0x108] sm:$0xff]  ;;  %970 = vmatprep.subr.bf16.mxu0 %v969_v3  ;;  %v175_v15 = vld [vmem:[%s1909_s3 + $0x198] sm:$0xff] }
   0x5   :  { %v1003_v12 = vpack.c.bf16 %v157_v10, %v156_v9  ;;  %1002 = vmatprep.subr.bf16.mxu1 %v1001_v7  ;;  %v1005_v17 = vpack.c.bf16 %v175_v15, %v174_v14  ;;  %v126_v18 = vld [vmem:[%s1909_s3 + $0x10] sm:$0xff]  ;;  %v127_v19 = vld [vmem:[%s1909_s3 + $0x18] sm:$0xff]  ;;  %v144_v23 = vld [vmem:[%s1909_s3 + $0xa0] sm:$0xff]  ;;  %v1406_v13 = vsub.s32 %v225_v63, %v227_v0 }
   0x6   :  { %972 = vmatpush3.bf16.msra.mxu0 %v971_v8  ;;  %v158_v20 = vld [vmem:[%s1909_s3 + $0x110] sm:$0xff]  ;;  %v975_v21 = vpack.c.bf16 %v127_v19, %v126_v18  ;;  %v159_v22 = vld [vmem:[%s1909_s3 + $0x118] sm:$0xff]  ;;  %v145_v24 = vld [vmem:[%s1909_s3 + $0xa8] sm:$0xff] }
   0x7   :  { %1004 = vmatpush3.bf16.msra.mxu1 %v1003_v12  ;;  %974 = vmatprep.subr.bf16.mxu0 %v973_v16  ;;  %v1007_v25 = vpack.c.bf16 %v159_v22, %v158_v20  ;;  %v977_v26 = vpack.c.bf16 %v145_v24, %v144_v23  ;;  %v176_v27 = vld [vmem:[%s1909_s3 + $0x1a0] sm:$0xff]  ;;  %v177_v28 = vld [vmem:[%s1909_s3 + $0x1a8] sm:$0xff]  ;;  %v146_v35 = vld [vmem:[%s1909_s3 + $0xb0] sm:$0xff] }
   0x8   :  { %1006 = vmatprep.subr.bf16.mxu1 %v1005_v17  ;;  %v128_v29 = vld [vmem:[%s1909_s3 + $0x20] sm:$0xff]  ;;  %v1009_v30 = vpack.c.bf16 %v177_v28, %v176_v27  ;;  %v129_v31 = vld [vmem:[%s1909_s3 + $0x28] sm:$0xff]  ;;  %v147_v36 = vld [vmem:[%s1909_s3 + $0xb8] sm:$0xff] }
   0x9   :  { %v160_v32 = vld [vmem:[%s1909_s3 + $0x120] sm:$0xff]  ;;  %v161_v33 = vld [vmem:[%s1909_s3 + $0x128] sm:$0xff]  ;;  %v979_v34 = vpack.c.bf16 %v129_v31, %v128_v29  ;;  %v178_v37 = vld [vmem:[%s1909_s3 + $0x1b0] sm:$0xff]  ;;  %v981_v39 = vpack.c.bf16 %v147_v36, %v146_v35 }
   0xa   :  { %976 = vmatpush3.bf16.msra.mxu0 %v975_v21  ;;  %v1011_v38 = vpack.c.bf16 %v161_v33, %v160_v32  ;;  %v179_v40 = vld [vmem:[%s1909_s3 + $0x1b8] sm:$0xff]  ;;  %v130_v41 = vld [vmem:[%s1909_s3 + $0x30] sm:$0xff]  ;;  %v148_v46 = vld [vmem:[%s1909_s3 + $0xc0] sm:$0xff] }
   0xb   :  { %1008 = vmatpush3.bf16.msra.mxu1 %v1007_v25  ;;  %978 = vmatprep.subr.bf16.mxu0 %v977_v26  ;;  %v131_v42 = vld [vmem:[%s1909_s3 + $0x38] sm:$0xff]  ;;  %v1013_v43 = vpack.c.bf16 %v179_v40, %v178_v37  ;;  %v162_v44 = vld [vmem:[%s1909_s3 + $0x130] sm:$0xff]  ;;  %v149_v50 = vld [vmem:[%s1909_s3 + $0xc8] sm:$0xff] }
   0xc   :  { %1010 = vmatprep.subr.bf16.mxu1 %v1009_v30  ;;  %v163_v45 = vld [vmem:[%s1909_s3 + $0x138] sm:$0xff]  ;;  %v180_v51 = vld [vmem:[%s1909_s3 + $0x1c0] sm:$0xff]  ;;  %v181_v52 = vld [vmem:[%s1909_s3 + $0x1c8] sm:$0xff]  ;;  %v983_v53 = vpack.c.bf16 %v131_v42, %v130_v41  ;;  %v985_v55 = vpack.c.bf16 %v149_v50, %v148_v46 }
   0xd   :  { %v1015_v54 = vpack.c.bf16 %v163_v45, %v162_v44  ;;  %v132_v56 = vld [vmem:[%s1909_s3 + $0x40] sm:$0xff]  ;;  %v133_v57 = vld [vmem:[%s1909_s3 + $0x48] sm:$0xff]  ;;  %v1017_v59 = vpack.c.bf16 %v181_v52, %v180_v51  ;;  %v150_v61 = vld [vmem:[%s1909_s3 + $0xd0] sm:$0xff] }
   0xe   :  { %980 = vmatpush3.bf16.msra.mxu0 %v979_v34  ;;  %v164_v58 = vld [vmem:[%s1909_s3 + $0x140] sm:$0xff]  ;;  %v165_v60 = vld [vmem:[%s1909_s3 + $0x148] sm:$0xff]  ;;  %v151_v62 = vld [vmem:[%s1909_s3 + $0xd8] sm:$0xff]  ;;  %v987_v3 = vpack.c.bf16 %v133_v57, %v132_v56 }
   0xf   :  { %1012 = vmatpush3.bf16.msra.mxu1 %v1011_v38  ;;  %982 = vmatprep.subr.bf16.mxu0 %v981_v39  ;;  %v182_v1 = vld [vmem:[%s1909_s3 + $0x1d0] sm:$0xff]  ;;  %v183_v2 = vld [vmem:[%s1909_s3 + $0x1d8] sm:$0xff]  ;;  %v1019_v4 = vpack.c.bf16 %v165_v60, %v164_v58  ;;  %v989_v5 = vpack.c.bf16 %v151_v62, %v150_v61  ;;  %v152_v11 = vld [vmem:[%s1909_s3 + $0xe0] sm:$0xff] }
  0x10   :  { %1014 = vmatprep.subr.bf16.mxu1 %v1013_v43  ;;  %v134_v6 = vld [vmem:[%s1909_s3 + $0x50] sm:$0xff]  ;;  %v135_v7 = vld [vmem:[%s1909_s3 + $0x58] sm:$0xff]  ;;  %v1021_v9 = vpack.c.bf16 %v183_v2, %v182_v1  ;;  %v153_v12 = vld [vmem:[%s1909_s3 + $0xe8] sm:$0xff] }
  0x11   :  { %v166_v8 = vld [vmem:[%s1909_s3 + $0x150] sm:$0xff]  ;;  %v167_v10 = vld [vmem:[%s1909_s3 + $0x158] sm:$0xff]  ;;  %v184_v14 = vld [vmem:[%s1909_s3 + $0x1e0] sm:$0xff]  ;;  %v991_v16 = vpack.c.bf16 %v135_v7, %v134_v6  ;;  %v993_v19 = vpack.c.bf16 %v153_v12, %v152_v11 }
  0x12   :  { %984 = vmatpush3.bf16.msra.mxu0 %v983_v53  ;;  %v185_v15 = vld [vmem:[%s1909_s3 + $0x1e8] sm:$0xff]  ;;  %v136_v17 = vld [vmem:[%s1909_s3 + $0x60] sm:$0xff]  ;;  %v1023_v18 = vpack.c.bf16 %v167_v10, %v166_v8  ;;  %v154_v25 = vld [vmem:[%s1909_s3 + $0xf0] sm:$0xff] }
  0x13   :  { %1016 = vmatpush3.bf16.msra.mxu1 %v1015_v54  ;;  %986 = vmatprep.subr.bf16.mxu0 %v985_v55  ;;  %v137_v20 = vld [vmem:[%s1909_s3 + $0x68] sm:$0xff]  ;;  %v168_v21 = vld [vmem:[%s1909_s3 + $0x160] sm:$0xff]  ;;  %v1025_v23 = vpack.c.bf16 %v185_v15, %v184_v14  ;;  %v155_v26 = vld [vmem:[%s1909_s3 + $0xf8] sm:$0xff] }
  0x14   :  { %1018 = vmatprep.subr.bf16.mxu1 %v1017_v59  ;;  %v122_v22 = vld [vmem:[%s1907_s1] sm:$0xff]  ;;  %v169_v24 = vld [vmem:[%s1909_s3 + $0x168] sm:$0xff]  ;;  %v186_v29 = vld [vmem:[%s1909_s3 + $0x1f0] sm:$0xff]  ;;  %v995_v31 = vpack.c.bf16 %v137_v20, %v136_v17  ;;  %v997_v35 = vpack.c.bf16 %v155_v26, %v154_v25 }
  0x15   :  { %v229_v27 = vrot.slane %v122_v22, %v1406_v13  ;;  %v222_v28 = vcombine.high %v122_v22, %v122_v22  ;;  %v187_v30 = vld [vmem:[%s1909_s3 + $0x1f8] sm:$0xff]  ;;  %v1027_v34 = vpack.c.bf16 %v169_v24, %v168_v21  ;;  %v138_v36 = vld [vmem:[%s1909_s3 + $0x70] sm:$0xff]  ;;  %v204_v42 = vld [vmem:[%s1909_s3 + $0x280] sm:$0xff] }
  0x16   :  { %988 = vmatpush3.bf16.msra.mxu0 %v987_v3  ;;  %v139_v37 = vld [vmem:[%s1909_s3 + $0x78] sm:$0xff]  ;;  %v170_v38 = vld [vmem:[%s1909_s3 + $0x170] sm:$0xff]  ;;  %v1029_v39 = vpack.c.bf16 %v187_v30, %v186_v29  ;;  %v205_v43 = vld [vmem:[%s1909_s3 + $0x288] sm:$0xff] }
  0x17   :  { %1020 = vmatpush3.bf16.msra.mxu1 %v1019_v4  ;;  %990 = vmatprep.subr.bf16.mxu0 %v989_v5  ;;  %v237_v32 = vcombine.high %v229_v27, %v229_v27  ;;  %v236_v33 = vrot.slane %v222_v28, %v1406_v13  ;;  %v171_v40 = vld [vmem:[%s1909_s3 + $0x178] sm:$0xff]  ;;  %v42_v44 = vld [vmem:[%s1908_s2 + $0x80] sm:$0xff]  ;;  %v43_v45 = vld [vmem:[%s1908_s2 + $0x88] sm:$0xff]  ;;  %v999_v46 = vpack.c.bf16 %v139_v37, %v138_v36 }
  0x18   :  { %1022 = vmatprep.subr.bf16.mxu1 %v1021_v9  ;;  %v1031_v47 = vpack.c.bf16 %v171_v40, %v170_v38  ;;  %v1033_v48 = vpack.c.bf16 %v205_v43, %v204_v42  ;;  %v188_v49 = vld [vmem:[%s1909_s3 + $0x200] sm:$0xff]  ;;  %v189_v50 = vld [vmem:[%s1909_s3 + $0x208] sm:$0xff]  ;;  %v1065_v52 = vpack.c.bf16 %v43_v45, %v42_v44  ;;  %v206_v54 = vld [vmem:[%s1909_s3 + $0x290] sm:$0xff] }
  0x19   :  { %317 = vmatprep.mubr.f32.mxu0 %v237_v32  ;;  %v238_v41 = vcombine.high %v236_v33, %v236_v33  ;;  %v26_v51 = vld [vmem:[%s1908_s2] sm:$0xff]  ;;  %v27_v53 = vld [vmem:[%s1908_s2 + $0x8] sm:$0xff]  ;;  %v207_v55 = vld [vmem:[%s1909_s3 + $0x298] sm:$0xff]  ;;  %v1035_v58 = vpack.c.bf16 %v189_v50, %v188_v49 }
  0x1a   :  { %992 = vmatpush3.bf16.msra.mxu0 %v991_v16  ;;  %v44_v56 = vld [vmem:[%s1908_s2 + $0x90] sm:$0xff]  ;;  %v45_v57 = vld [vmem:[%s1908_s2 + $0x98] sm:$0xff]  ;;  %v1067_v59 = vpack.c.bf16 %v27_v53, %v26_v51  ;;  %v1037_v60 = vpack.c.bf16 %v207_v55, %v206_v54  ;;  %v208_v2 = vld [vmem:[%s1909_s3 + $0x2a0] sm:$0xff] }
  0x1b   :  { %1024 = vmatpush3.bf16.msra.mxu1 %v1023_v18  ;;  %994 = vmatprep.subr.bf16.mxu0 %v993_v19  ;;  %v190_v61 = vld [vmem:[%s1909_s3 + $0x210] sm:$0xff]  ;;  %v191_v62 = vld [vmem:[%s1909_s3 + $0x218] sm:$0xff]  ;;  %v1069_v0 = vpack.c.bf16 %v45_v57, %v44_v56  ;;  %v209_v3 = vld [vmem:[%s1909_s3 + $0x2a8] sm:$0xff] }
  0x1c   :  { %1026 = vmatprep.subr.bf16.mxu1 %v1025_v23  ;;  %387 = vmatprep.mubr.f32.mxu1 %v238_v41  ;;  %v28_v63 = vld [vmem:[%s1908_s2 + $0x10] sm:$0xff]  ;;  %v29_v1 = vld [vmem:[%s1908_s2 + $0x18] sm:$0xff]  ;;  %v46_v4 = vld [vmem:[%s1908_s2 + $0xa0] sm:$0xff]  ;;  %v1039_v6 = vpack.c.bf16 %v191_v62, %v190_v61  ;;  %v1041_v8 = vpack.c.bf16 %v209_v3, %v208_v2 }
  0x1d   :  { %v47_v5 = vld [vmem:[%s1908_s2 + $0xa8] sm:$0xff]  ;;  %v1071_v7 = vpack.c.bf16 %v29_v1, %v28_v63  ;;  %v192_v9 = vld [vmem:[%s1909_s3 + $0x220] sm:$0xff]  ;;  %v210_v15 = vld [vmem:[%s1909_s3 + $0x2b0] sm:$0xff] }
  0x1e   :  { %996 = vmatpush3.bf16.msra.mxu0 %v995_v31  ;;  %v193_v10 = vld [vmem:[%s1909_s3 + $0x228] sm:$0xff]  ;;  %v30_v11 = vld [vmem:[%s1908_s2 + $0x20] sm:$0xff]  ;;  %v1073_v12 = vpack.c.bf16 %v47_v5, %v46_v4  ;;  %v211_v16 = vld [vmem:[%s1909_s3 + $0x2b8] sm:$0xff] }
  0x1f   :  { %1028 = vmatpush3.bf16.msra.mxu1 %v1027_v34  ;;  %998 = vmatprep.subr.bf16.mxu0 %v997_v35  ;;  %v31_v14 = vld [vmem:[%s1908_s2 + $0x28] sm:$0xff]  ;;  %v48_v17 = vld [vmem:[%s1908_s2 + $0xb0] sm:$0xff]  ;;  %v49_v18 = vld [vmem:[%s1908_s2 + $0xb8] sm:$0xff]  ;;  %v1043_v19 = vpack.c.bf16 %v193_v10, %v192_v9  ;;  %v1045_v21 = vpack.c.bf16 %v211_v16, %v210_v15 }
  0x20   :  { %1030 = vmatprep.subr.bf16.mxu1 %v1029_v39  ;;  %v1075_v20 = vpack.c.bf16 %v31_v14, %v30_v11  ;;  %v194_v22 = vld [vmem:[%s1909_s3 + $0x230] sm:$0xff]  ;;  %v195_v23 = vld [vmem:[%s1909_s3 + $0x238] sm:$0xff]  ;;  %v1077_v25 = vpack.c.bf16 %v49_v18, %v48_v17  ;;  %v213_v28 = vld [vmem:[%s1909_s3 + $0x2c8] sm:$0xff] }
  0x21   :  { %v32_v24 = vld [vmem:[%s1908_s2 + $0x30] sm:$0xff]  ;;  %v33_v26 = vld [vmem:[%s1908_s2 + $0x38] sm:$0xff]  ;;  %v50_v29 = vld [vmem:[%s1908_s2 + $0xc0] sm:$0xff]  ;;  %v1047_v32 = vpack.c.bf16 %v195_v23, %v194_v22 }
  0x22   :  { %1000 = vmatpush3.bf16.msra.mxu0 %v999_v46  ;;  %v51_v30 = vld [vmem:[%s1908_s2 + $0xc8] sm:$0xff]  ;;  %v1573_v34 = vld [vmem:[%s1906_s0] sm:$0xff]  ;;  %v1079_v35 = vpack.c.bf16 %v33_v26, %v32_v24  ;;  %v214_v43 = vld [vmem:[%s1909_s3 + $0x2d0] sm:$0xff] }
  0x23   :  { %1032 = vmatpush3.bf16.msra.mxu1 %v1031_v47  ;;  %1034 = vmatprep.subr.bf16.mxu0 %v1033_v48  ;;  %v1566_v31 = vld.sshfl [vmem:[%s1907_s1 + $0x8] sm:$0x33 pattern:$0x76325410]  ;;  %v196_v37 = vld [vmem:[%s1909_s3 + $0x240] sm:$0xff]  ;;  %v1586_v40 = vrot.slane %v1573_v34, %v1406_v13  ;;  %v1081_v41 = vpack.c.bf16 %v51_v30, %v50_v29  ;;  %v215_v44 = vld [vmem:[%s1909_s3 + $0x2d8] sm:$0xff] }
  0x24   :  { %1066 = vmatprep.subr.bf16.mxu1 %v1065_v52  ;;  %v197_v38 = vld [vmem:[%s1909_s3 + $0x248] sm:$0xff]  ;;  %v34_v39 = vld [vmem:[%s1908_s2 + $0x40] sm:$0xff]  ;;  %v52_v45 = vld [vmem:[%s1908_s2 + $0xd0] sm:$0xff]  ;;  %v1053_v50 = vpack.c.bf16 %v215_v44, %v214_v43 }
  0x25   :  { %318 = vmatmul.mubr.f32.vlgmr.msra.gmra.mrb[0].mxu0 %v229_v27  ;;  %v212_v27 = vld [vmem:[%s1909_s3 + $0x2c0] sm:$0xff]  ;;  %v35_v42 = vld [vmem:[%s1908_s2 + $0x48] sm:$0xff]  ;;  %v53_v46 = vld [vmem:[%s1908_s2 + $0xd8] sm:$0xff]  ;;  %v480_v47 = vcombine.high %v1586_v40, %v1586_v40  ;;  %v1051_v48 = vpack.c.bf16 %v197_v38, %v196_v37 }
  0x26   :  { %388 = vmatmul.mubr.f32.vlgmr.msra.gmra.mrb[0].mxu1 %v236_v33  ;;  %1036 = vmatpush3.bf16.msra.mxu0 %v1035_v58  ;;  %v246_v33 = vcombine.high %v1566_v31, %v1566_v31  ;;  %v1049_v36 = vpack.c.bf16 %v213_v28, %v212_v27  ;;  %v1083_v49 = vpack.c.bf16 %v35_v42, %v34_v39  ;;  %v198_v51 = vld [vmem:[%s1909_s3 + $0x250] sm:$0xff]  ;;  %v199_v52 = vld [vmem:[%s1909_s3 + $0x258] sm:$0xff]  ;;  %v216_v56 = vld [vmem:[%s1909_s3 + $0x2e0] sm:$0xff] }
  0x27   :  { %1068 = vmatpush3.bf16.msra.mxu1 %v1067_v59  ;;  %1038 = vmatprep.subr.bf16.mxu0 %v1037_v60  ;;  %v36_v53 = vld [vmem:[%s1908_s2 + $0x50] sm:$0xff]  ;;  %v1085_v54 = vpack.c.bf16 %v53_v46, %v52_v45  ;;  %v37_v55 = vld [vmem:[%s1908_s2 + $0x58] sm:$0xff]  ;;  %v217_v57 = vld [vmem:[%s1909_s3 + $0x2e8] sm:$0xff]  ;;  %v1055_v60 = vpack.c.bf16 %v199_v52, %v198_v51 }
  0x28   :  { %1070 = vmatprep.subr.bf16.mxu1 %v1069_v0  ;;  %457 = vmatprep.mubr.f32.mxu0 %v246_v33  ;;  %v54_v58 = vld [vmem:[%s1908_s2 + $0xe0] sm:$0xff]  ;;  %v55_v59 = vld [vmem:[%s1908_s2 + $0xe8] sm:$0xff]  ;;  %v1087_v61 = vpack.c.bf16 %v37_v55, %v36_v53  ;;  %v1057_v62 = vpack.c.bf16 %v217_v57, %v216_v56  ;;  %v218_v4 = vld [vmem:[%s1909_s3 + $0x2f0] sm:$0xff] }
  0x29   :  { %560 = vmatprep.mubr.f32.mxu1 %v480_v47  ;;  %v200_v63 = vld [vmem:[%s1909_s3 + $0x260] sm:$0xff]  ;;  %v201_v0 = vld [vmem:[%s1909_s3 + $0x268] sm:$0xff]  ;;  %v1089_v2 = vpack.c.bf16 %v55_v59, %v54_v58  ;;  %v219_v5 = vld [vmem:[%s1909_s3 + $0x2f8] sm:$0xff] }
  0x2a   :  { %1040 = vmatpush3.bf16.msra.mxu0 %v1039_v6  ;;  %v38_v1 = vld [vmem:[%s1908_s2 + $0x60] sm:$0xff]  ;;  %v39_v3 = vld [vmem:[%s1908_s2 + $0x68] sm:$0xff]  ;;  %v56_v6 = vld [vmem:[%s1908_s2 + $0xf0] sm:$0xff]  ;;  %v1061_v10 = vpack.c.bf16 %v219_v5, %v218_v4 }
  0x2b   :  { %1072 = vmatpush3.bf16.msra.mxu1 %v1071_v7  ;;  %1042 = vmatprep.subr.bf16.mxu0 %v1041_v8  ;;  %v57_v7 = vld [vmem:[%s1908_s2 + $0xf8] sm:$0xff]  ;;  %v1059_v8 = vpack.c.bf16 %v201_v0, %v200_v63  ;;  %v1091_v9 = vpack.c.bf16 %v39_v3, %v38_v1  ;;  %v202_v11 = vld [vmem:[%s1909_s3 + $0x270] sm:$0xff]  ;;  %v74_v17 = vld [vmem:[%s1908_s2 + $0x180] sm:$0xff] }
  0x2c   :  { %1074 = vmatprep.subr.bf16.mxu1 %v1073_v12  ;;  %v203_v12 = vld [vmem:[%s1909_s3 + $0x278] sm:$0xff]  ;;  %v40_v14 = vld [vmem:[%s1908_s2 + $0x70] sm:$0xff]  ;;  %v1093_v15 = vpack.c.bf16 %v57_v7, %v56_v6  ;;  %v75_v18 = vld [vmem:[%s1908_s2 + $0x188] sm:$0xff] }
  0x2d   :  { %v41_v16 = vld [vmem:[%s1908_s2 + $0x78] sm:$0xff]  ;;  %v1063_v22 = vpack.c.bf16 %v203_v12, %v202_v11  ;;  %v1097_v24 = vpack.c.bf16 %v75_v18, %v74_v17  ;;  %v59_v26 = vld [vmem:[%s1908_s2 + $0x108] sm:$0xff]  ;;  %v90_v27 = vld [vmem:[%s1908_s2 + $0x200] sm:$0xff] }
  0x2e   :  { %1044 = vmatpush3.bf16.msra.mxu0 %v1043_v19  ;;  %v465_v19 = vcombine.high %v1573_v34, %v1573_v34  ;;  %v1095_v23 = vpack.c.bf16 %v41_v16, %v40_v14  ;;  %v91_v29 = vld [vmem:[%s1908_s2 + $0x208] sm:$0xff]  ;;  %v76_v30 = vld [vmem:[%s1908_s2 + $0x190] sm:$0xff]  ;;  %v61_v38 = vld [vmem:[%s1908_s2 + $0x118] sm:$0xff] }
  0x2f   :  { %1076 = vmatpush3.bf16.msra.mxu1 %v1075_v20  ;;  %1046 = vmatprep.subr.bf16.mxu0 %v1045_v21  ;;  %v106_v20 = vld [vmem:[%s1908_s2 + $0x280] sm:$0xff]  ;;  %v107_v21 = vld [vmem:[%s1908_s2 + $0x288] sm:$0xff]  ;;  %v108_v34 = vld [vmem:[%s1908_s2 + $0x290] sm:$0xff]  ;;  %v1131_v39 = vpack.c.bf16 %v91_v29, %v90_v27 }
  0x30   :  { %1078 = vmatprep.subr.bf16.mxu1 %v1077_v25  ;;  %v58_v25 = vld [vmem:[%s1908_s2 + $0x100] sm:$0xff]  ;;  %v1129_v28 = vpack.c.bf16 %v107_v21, %v106_v20  ;;  %v1698_v33 = vrot.slane %v465_v19, %v1406_v13  ;;  %v60_v37 = vld [vmem:[%s1908_s2 + $0x110] sm:$0xff]  ;;  %v1718_v42 = vld.sshfl [vmem:[%s1906_s0 + $0x8] sm:$0x33 pattern:$0x76325410] }
  0x31   :  { %v92_v13 = vld [vmem:[%s1908_s2 + $0x210] sm:$0xff] }
  0x32   :  { %1048 = vmatpush3.bf16.msra.mxu0 %v1047_v32  ;;  %v77_v32 = vld [vmem:[%s1908_s2 + $0x198] sm:$0xff] }
  0x33   :  { %1080 = vmatpush3.bf16.msra.mxu1 %v1079_v35  ;;  %1050 = vmatprep.subr.bf16.mxu0 %v1049_v36  ;;  %v109_v35 = vld [vmem:[%s1908_s2 + $0x298] sm:$0xff]  ;;  %v1099_v36 = vpack.c.bf16 %v59_v26, %v58_v25 }
  0x34   :  { %1082 = vmatprep.subr.bf16.mxu1 %v1081_v41  ;;  %v1101_v41 = vpack.c.bf16 %v77_v32, %v76_v30 }
  0x36   :  { %1052 = vmatpush3.bf16.msra.mxu0 %v1051_v48 }
  0x37   :  { %1084 = vmatpush3.bf16.msra.mxu1 %v1083_v49  ;;  %1054 = vmatprep.subr.bf16.mxu0 %v1053_v50 }
  0x38   :  { %1086 = vmatprep.subr.bf16.mxu1 %v1085_v54 }
  0x3a   :  { %1056 = vmatpush3.bf16.msra.mxu0 %v1055_v60 }
  0x3b   :  { %1088 = vmatpush3.bf16.msra.mxu1 %v1087_v61  ;;  %1058 = vmatprep.subr.bf16.mxu0 %v1057_v62 }
  0x3c   :  { %1090 = vmatprep.subr.bf16.mxu1 %v1089_v2 }
  0x3e   :  { %1060 = vmatpush3.bf16.msra.mxu0 %v1059_v8 }
  0x3f   :  { %1092 = vmatpush3.bf16.msra.mxu1 %v1091_v9  ;;  %1062 = vmatprep.subr.bf16.mxu0 %v1061_v10 }
  0x40   :  { %1094 = vmatprep.subr.bf16.mxu1 %v1093_v15 }
  0x42   :  { %1064 = vmatpush3.bf16.msra.mxu0 %v1063_v22 }
  0x43   :  { %1096 = vmatpush3.bf16.msra.mxu1 %v1095_v23  ;;  %1098 = vmatprep.subr.bf16.mxu0 %v1097_v24 }
  0x44   :  { %13 = vsyncpa [#allocation5], 0  ;;  %1130 = vmatprep.subr.bf16.mxu1 %v1129_v28  ;;  %v1133_v43 = vpack.c.bf16 %v109_v35, %v108_v34  ;;  %v93_v44 = vld [vmem:[%s1908_s2 + $0x218] sm:$0xff]  ;;  %v78_v45 = vld [vmem:[%s1908_s2 + $0x1a0] sm:$0xff]  ;;  %v481_v47 = vcombine.high %v1698_v33, %v1698_v33  ;;  %v489_v50 = vcombine.high %v1718_v42, %v1718_v42  ;;  %v1103_v51 = vpack.c.bf16 %v61_v38, %v60_v37  ;;  %s1219_s13 = smov [#allocation2]  }
  0x45   :  { %v79_v46 = vld [vmem:[%s1908_s2 + $0x1a8] sm:$0xff]  ;;  %458 = vmatmul.mubr.f32.vlgmr.msra.gmra.mrb[2].mxu0 %v1566_v31  ;;  %v110_v48 = vld [vmem:[%s1908_s2 + $0x2a0] sm:$0xff]  ;;  %v1135_v52 = vpack.c.bf16 %v93_v44, %v92_v13  ;;  %v80_v57 = vld [vmem:[%s1908_s2 + $0x1b0] sm:$0xff]  ;;  %vm714_vm0 = vcmask 25600   ;;  %s734_s14 = sshll.u32 %s1219_s13, 4  ;;  %s735_s14 = int_to_ptr.vmem [resolvable:$true] %s734_s14 }
  0x46   :  { %v111_v49 = vld [vmem:[%s1908_s2 + $0x2a8] sm:$0xff]  ;;  %1100 = vmatpush3.bf16.msra.mxu0 %v1099_v36  ;;  %561 = vmatmul.mubr.f32.vlgmr.msra.gmra.mrb[2].mxu1 %v1586_v40  ;;  %v1105_v53 = vpack.c.bf16 %v79_v46, %v78_v45  ;;  %v62_v31 = vld [vmem:[%s1908_s2 + $0x120] sm:$0xff]  ;;  %v81_v58 = vld [vmem:[%s1908_s2 + $0x1b8] sm:$0xff]  ;;  %p1175_p1 = scmp.lt.s32.totalorder %s735_s14, %s735_s14 }
  0x47   :  { %1132 = vmatpush3.bf16.msra.mxu1 %v1131_v39  ;;  %1102 = vmatprep.subr.bf16.mxu0 %v1101_v41  ;;  %v63_v54 = vld [vmem:[%s1908_s2 + $0x128] sm:$0xff]  ;;  %v94_v55 = vld [vmem:[%s1908_s2 + $0x220] sm:$0xff]  ;;  %v1137_v56 = vpack.c.bf16 %v111_v49, %v110_v48  ;;  %v112_v59 = vld [vmem:[%s1908_s2 + $0x2b0] sm:$0xff]  ;;  %v1109_v63 = vpack.c.bf16 %v81_v58, %v80_v57 }
  0x48   :  { %1134 = vmatprep.subr.bf16.mxu1 %v1133_v43  ;;  %v95_v40 = vld [vmem:[%s1908_s2 + $0x228] sm:$0xff]  ;;  %630 = vmatprep.mubr.f32.mxu0 %v481_v47  ;;  %v113_v60 = vld [vmem:[%s1908_s2 + $0x2b8] sm:$0xff]  ;;  %v1107_v61 = vpack.c.bf16 %v63_v54, %v62_v31  ;;  %v64_v0 = vld [vmem:[%s1908_s2 + $0x130] sm:$0xff] }
  0x49   :  { %700 = vmatprep.mubr.f32.mxu1 %v489_v50  ;;  %v1139_v62 = vpack.c.bf16 %v95_v40, %v94_v55  ;;  %v65_v1 = vld [vmem:[%s1908_s2 + $0x138] sm:$0xff]  ;;  %v96_v2 = vld [vmem:[%s1908_s2 + $0x230] sm:$0xff]  ;;  %v1141_v3 = vpack.c.bf16 %v113_v60, %v112_v59  ;;  %v82_v5 = vld [vmem:[%s1908_s2 + $0x1c0] sm:$0xff] }
  0x4a   :  { %1104 = vmatpush3.bf16.msra.mxu0 %v1103_v51  ;;  %v97_v4 = vld [vmem:[%s1908_s2 + $0x238] sm:$0xff]  ;;  %v83_v6 = vld [vmem:[%s1908_s2 + $0x1c8] sm:$0xff]  ;;  %v114_v7 = vld [vmem:[%s1908_s2 + $0x2c0] sm:$0xff]  ;;  %v1111_v9 = vpack.c.bf16 %v65_v1, %v64_v0 }
  0x4b   :  { %1136 = vmatpush3.bf16.msra.mxu1 %v1135_v52  ;;  %1106 = vmatprep.subr.bf16.mxu0 %v1105_v53  ;;  %v115_v8 = vld [vmem:[%s1908_s2 + $0x2c8] sm:$0xff]  ;;  %v1143_v10 = vpack.c.bf16 %v97_v4, %v96_v2  ;;  %v1113_v11 = vpack.c.bf16 %v83_v6, %v82_v5  ;;  %v66_v12 = vld [vmem:[%s1908_s2 + $0x140] sm:$0xff]  ;;  %v84_v18 = vld [vmem:[%s1908_s2 + $0x1d0] sm:$0xff] }
  0x4c   :  { %1138 = vmatprep.subr.bf16.mxu1 %v1137_v56  ;;  %v67_v14 = vld [vmem:[%s1908_s2 + $0x148] sm:$0xff]  ;;  %v98_v15 = vld [vmem:[%s1908_s2 + $0x240] sm:$0xff]  ;;  %v1145_v16 = vpack.c.bf16 %v115_v8, %v114_v7  ;;  %v85_v19 = vld [vmem:[%s1908_s2 + $0x1d8] sm:$0xff] }
  0x4d   :  { %v99_v17 = vld [vmem:[%s1908_s2 + $0x248] sm:$0xff]  ;;  %v116_v20 = vld [vmem:[%s1908_s2 + $0x2d0] sm:$0xff]  ;;  %v117_v21 = vld [vmem:[%s1908_s2 + $0x2d8] sm:$0xff]  ;;  %v1115_v22 = vpack.c.bf16 %v67_v14, %v66_v12  ;;  %v1117_v24 = vpack.c.bf16 %v85_v19, %v84_v18 }
  0x4e   :  { %1108 = vmatpush3.bf16.msra.mxu0 %v1107_v61  ;;  %v1147_v23 = vpack.c.bf16 %v99_v17, %v98_v15  ;;  %v68_v25 = vld [vmem:[%s1908_s2 + $0x150] sm:$0xff]  ;;  %v69_v26 = vld [vmem:[%s1908_s2 + $0x158] sm:$0xff]  ;;  %v1149_v28 = vpack.c.bf16 %v117_v21, %v116_v20  ;;  %v86_v30 = vld [vmem:[%s1908_s2 + $0x1e0] sm:$0xff] }
  0x4f   :  { %1140 = vmatpush3.bf16.msra.mxu1 %v1139_v62  ;;  %1110 = vmatprep.subr.bf16.mxu0 %v1109_v63  ;;  %v100_v27 = vld [vmem:[%s1908_s2 + $0x250] sm:$0xff]  ;;  %v101_v29 = vld [vmem:[%s1908_s2 + $0x258] sm:$0xff]  ;;  %v87_v32 = vld [vmem:[%s1908_s2 + $0x1e8] sm:$0xff]  ;;  %v1119_v36 = vpack.c.bf16 %v69_v26, %v68_v25 }
  0x50   :  { %1142 = vmatprep.subr.bf16.mxu1 %v1141_v3  ;;  %v118_v34 = vld [vmem:[%s1908_s2 + $0x2e0] sm:$0xff]  ;;  %v119_v35 = vld [vmem:[%s1908_s2 + $0x2e8] sm:$0xff]  ;;  %v1151_v37 = vpack.c.bf16 %v101_v29, %v100_v27  ;;  %v1121_v38 = vpack.c.bf16 %v87_v32, %v86_v30  ;;  %v88_v45 = vld [vmem:[%s1908_s2 + $0x1f0] sm:$0xff] }
  0x51   :  { %v70_v13 = vld [vmem:[%s1908_s2 + $0x160] sm:$0xff]  ;;  %v71_v39 = vld [vmem:[%s1908_s2 + $0x168] sm:$0xff]  ;;  %v1153_v43 = vpack.c.bf16 %v119_v35, %v118_v34  ;;  %v89_v46 = vld [vmem:[%s1908_s2 + $0x1f8] sm:$0xff] }
  0x52   :  { %1112 = vmatpush3.bf16.msra.mxu0 %v1111_v9  ;;  %v102_v41 = vld [vmem:[%s1908_s2 + $0x260] sm:$0xff]  ;;  %v103_v44 = vld [vmem:[%s1908_s2 + $0x268] sm:$0xff]  ;;  %v120_v47 = vld [vmem:[%s1908_s2 + $0x2f0] sm:$0xff]  ;;  %v1123_v49 = vpack.c.bf16 %v71_v39, %v70_v13  ;;  %v1125_v51 = vpack.c.bf16 %v89_v46, %v88_v45 }
  0x53   :  { %1144 = vmatpush3.bf16.msra.mxu1 %v1143_v10  ;;  %1114 = vmatprep.subr.bf16.mxu0 %v1113_v11  ;;  %v121_v48 = vld [vmem:[%s1908_s2 + $0x2f8] sm:$0xff]  ;;  %v1155_v50 = vpack.c.bf16 %v103_v44, %v102_v41  ;;  %v72_v52 = vld [vmem:[%s1908_s2 + $0x170] sm:$0xff]  ;;  %v758_v14 = vld [vmem:[%s1910_s4] ss:$0 sm:$0xff]  ;;  %s1170_s4 = scalar_lea.vmem %s735_s14, 32 }
  0x54   :  { %1146 = vmatprep.subr.bf16.mxu1 %v1145_v16  ;;  %v73_v53 = vld [vmem:[%s1908_s2 + $0x178] sm:$0xff]  ;;  %v1157_v31 = vpack.c.bf16 %v121_v48, %v120_v47  ;;  %v104_v54 = vld [vmem:[%s1908_s2 + $0x270] sm:$0xff]  ;;  %p1171_p0 = scmp.ne.s32.totalorder %s735_s14, %s1170_s4  ;;  %p1176_p2 = scmp.lt.s32.totalorder %s1170_s4, %s1170_s4 }
  0x55   :  { %v105_v55 = vld [vmem:[%s1908_s2 + $0x278] sm:$0xff]  ;;  %v1127_v56 = vpack.c.bf16 %v73_v53, %v72_v52 }
  0x56   :  { %1116 = vmatpush3.bf16.msra.mxu0 %v1115_v22  ;;  %v1159_v40 = vpack.c.bf16 %v105_v55, %v104_v54  ;;  %p1177_p3 = por %p1176_p2, %p1175_p1 }
  0x57   :  { %1148 = vmatpush3.bf16.msra.mxu1 %v1147_v23  ;;  %1118 = vmatprep.subr.bf16.mxu0 %v1117_v24 }
  0x58   :  { %1150 = vmatprep.subr.bf16.mxu1 %v1149_v28  ;;  %p1178_p4 = pnand %p1177_p3, %p1171_p0 }
  0x5a   :  { %1120 = vmatpush3.bf16.msra.mxu0 %v1119_v36 }
  0x5b   :  { %1152 = vmatpush3.bf16.msra.mxu1 %v1151_v37  ;;  %1122 = vmatprep.subr.bf16.mxu0 %v1121_v38 }
  0x5c   :  { %1154 = vmatprep.subr.bf16.mxu1 %v1153_v43 }
  0x5e   :  { %1124 = vmatpush3.bf16.msra.mxu0 %v1123_v49 }
  0x5f   :  { %1156 = vmatpush3.bf16.msra.mxu1 %v1155_v50  ;;  %1126 = vmatprep.subr.bf16.mxu0 %v1125_v51 }
  0x60   :  { %1158 = vmatprep.subr.bf16.mxu1 %v1157_v31 }
  0x62   :  { %1128 = vmatpush3.bf16.msra.mxu0 %v1127_v56 }
  0x63   :  { %1160 = vmatpush3.bf16.msra.mxu1 %v1159_v40 }
  0x65   :  { %631 = vmatmul.mubr.f32.vlgmr.msra.gmra.mrb[4].mxu0 %v1698_v33 }
  0x66   :  { %701 = vmatmul.mubr.f32.vlgmr.msra.gmra.mrb[4].mxu1 %v1718_v42 }
  0xf8   :  { %v791_v57 = vpop.f32.mrb[0].mxu0 }
  0xf9   :  { %v826_v58 = vpop.f32.mrb[0].mxu1  ;;  %v792_v59 = vpop.f32.mrb[1].mxu0 }
  0xfa   :  { %v793_v60 = vadd.f32 %v792_v59, %v791_v57  ;;  %v827_v61 = vpop.f32.mrb[1].mxu1 }
  0xfb   :  { %v828_v62 = vadd.f32 %v827_v61, %v826_v58 }
  0xfd   :  { %v390_v63 = vadd.f32 %v828_v62, %v793_v60 }
 0x118   :  { %v861_v0 = vpop.f32.mrb[2].mxu0 }
 0x119   :  { %v862_v1 = vpop.f32.mrb[3].mxu0  ;;  %v896_v2 = vpop.f32.mrb[2].mxu1 }
 0x11a   :  { %v863_v3 = vadd.f32 %v862_v1, %v861_v0  ;;  %v897_v4 = vpop.f32.mrb[3].mxu1 }
 0x11b   :  { %v898_v5 = vadd.f32 %v897_v4, %v896_v2 }
 0x11c   :  { %v460_v6 = vadd.f32 %v863_v3, %v390_v63 }
 0x11e   :  { %v563_v7 = vadd.f32 %v898_v5, %v460_v6 }
 0x138   :  { %v931_v8 = vpop.f32.mrb[4].mxu0 }
 0x139   :  { %v932_v9 = vpop.f32.mrb[5].mxu0  ;;  %v966_v33 = vpop.f32.mrb[4].mxu1 }
 0x13a   :  { %v933_v10 = vadd.f32 %v932_v9, %v931_v8  ;;  %v967_v42 = vpop.f32.mrb[5].mxu1 }
 0x13b   :  { %v968_v11 = vadd.f32 %v967_v42, %v966_v33 }
 0x13c   :  { %v633_v12 = vadd.f32 %v933_v10, %v563_v7 }
 0x13e   :  { %v703_v15 = vadd.f32 %v968_v11, %v633_v12 }
 0x140   :  { %v713_v16 = vadd.f32 %v758_v14, %v703_v15 }
 0x142   :  { %v716_v17 = vsel %vm714_vm0, %v713_v16, -inf  ;;  %715 = vst.msk [vmem:[#allocation2] sm:$0x3] %vm714_vm0, %v713_v16 }
 0x143   :  { %717 = vmax.xlane.f32.xlu0 %v716_v17 }
 0x1d0   :  { %v718_v18 = vpop.xlane.xlu0 %717 }
 0x1d1   :  { %v719_v19 = vsub.f32 %v713_v16, %v718_v18 }
 0x1d3   :  { %v720_v20 = vmul.f32 1.442695, %v719_v19 }
 0x1d5   :  { %1166 = vpow2.f32 %v720_v20 }
 0x1df   :  { %v1167_v21 = vpop.eup %1166 }
 0x1e0   :  { %v722_v22 = vsel %vm714_vm0, %v1167_v21, 0.0 }
 0x1e1   :  { %723 = vadd.xlane.f32.xlu0 %v722_v22 }
 0x1e2   :  { %1181 = shalt.err (!%p1178_p4)
}
 0x1e3   :  { %s1182_s17 = scalar_lea.hbm %s1911_s5, 32 }
 0x1e4   :  { %p1183_p5 = scmp.ne.s32.totalorder %s1911_s5, %s1182_s17  ;;  %p1186_p6 = scmp.lt.u32.totalorder %s1182_s17, %s1911_s5 }
 0x1e6   :  { %p1188_p7 = pnand %p1186_p6, %p1183_p5 }
 0x1e8   :  { %1191 = shalt.err (!%p1188_p7)
}
 0x1e9   :  { %737 = dma.vmem_to_hbm [thread:$0]  %s735_s14, 32, %s1911_s5, [#allocation3]  }
 0x1ea   :  { %s1220_s23 = smov [#allocation4]  }
 0x1eb   :  { %s744_s24 = sshll.u32 %s1220_s23, 4  ;;  %s745_s24 = int_to_ptr.vmem [resolvable:$true] %s744_s24 }
 0x1ec   :  { %s1192_s25 = scalar_lea.vmem %s745_s24, 32  ;;  %p1197_p9 = scmp.lt.s32.totalorder %s745_s24, %s745_s24 }
 0x1ed   :  { %p1193_p8 = scmp.ne.s32.totalorder %s745_s24, %s1192_s25  ;;  %p1198_p10 = scmp.lt.s32.totalorder %s1192_s25, %s1192_s25 }
 0x1ef   :  { %p1199_p11 = por %p1198_p10, %p1197_p9 }
 0x1f1   :  { %p1200_p12 = pnand %p1199_p11, %p1193_p8 }
 0x26e   :  { %v724_v23 = vpop.xlane.xlu0 %723 }
 0x26f   :  { %1168 = vrcp.f32 %v724_v23 }
 0x279   :  { %v1169_v24 = vpop.eup %1168 }
 0x27a   :  { %v726_v25 = vmul.f32 %v1169_v24, %v1167_v21 }
 0x27c   :  { %727 = vst.msk [vmem:[#allocation4] sm:$0x3] %vm714_vm0, %v726_v25 }
 0x27d   :  { %1203 = shalt.err (!%p1200_p12)
}
 0x27e   :  { %s1204_s5 = scalar_lea.hbm %s1912_s6, 32 }
 0x27f   :  { %p1205_p13 = scmp.ne.s32.totalorder %s1912_s6, %s1204_s5  ;;  %p1208_p0 = scmp.lt.u32.totalorder %s1204_s5, %s1912_s6 }
 0x281   :  { %p1210_p1 = pnand %p1208_p0, %p1205_p13 }
 0x283   :  { %1213 = shalt.err (!%p1210_p1)
}
 0x284   :  { %747 = dma.vmem_to_hbm [thread:$0]  %s745_s24, 32, %s1912_s6, [#allocation5]  }
 0x285   :  { %1214 = dma.done.wait [#allocation3], 32  }
 0x286   :  { %1215 = vsyncadd [#allocation3], 4294967264 }
 0x287   :  { %1216 = dma.done.wait [#allocation5], 32  }
 0x288   :  { %1217 = vsyncadd [#allocation5], 4294967264 }
 0x289   :  { %754 = vsyncpa [#allocation3], 1 }
 0x28a   :  { %755 = vsyncpa [#allocation5], 1 }

</bundles_post_ra>
